<compile_context>
chip_gen: v7x
topology: tpu7x:2x2x1
jax: 0.10.0
libtpu: 0.0.40
codegen_flags: <defaults>
</compile_context>

<pallas_src>
import jax
import jax.numpy as jnp
from jax.experimental import pallas as pl
from jax.experimental.pallas import tpu as pltpu
import numpy as np


def attention_kernel(x_ref, w_ref, b_ref, o_ref, num_ref, den_ref):
    s_idx = pl.program_id(1)

    @pl.when(s_idx == 0)
    def _init():
        num_ref[...] = jnp.zeros_like(num_ref)
        den_ref[...] = jnp.zeros_like(den_ref)

    x = x_ref[...].astype(jnp.float32)   # (ts, tb, A)  (sub-f32 inputs upcast here)
    w = w_ref[...].astype(jnp.float32)   # (1, A)
    b = b_ref[...].astype(jnp.float32)   # (1, A)

    # Logit matvec on VPU + XLU lane-reduce over the full A axis.
    xw = jnp.sum(x * w[None, :, :], axis=-1, keepdims=True)     # (ts, tb, 1)
    t = jnp.tanh(xw + b[None, :, :])                             # (ts, tb, A)
    # |t| <= 1 (tanh), so exp never overflows: max-stabilization is unnecessary
    # and the S reduction stays single-pass (no online-softmax machinery).
    e = jnp.exp(t)

    num_ref[...] += jnp.sum(x * e, axis=0)                       # (tb, A)
    den_ref[...] += jnp.sum(e, axis=0)                           # (tb, A)

    @pl.when(s_idx == pl.num_programs(1) - 1)
    def _finalize():
        den = den_ref[...]
        # EUP approximate reciprocal + one Newton step (f32 accuracy, no divides).
        r = pl.reciprocal(den, approx=True)
        r = r * (2.0 - den * r)
        o_ref[...] = (num_ref[...] * r).astype(o_ref.dtype)


def _pick_batch_tile(batch, cap=128):
    if batch <= cap:
        return batch
    d = cap - (cap % 8)
    while d >= 8:
        if batch % d == 0:
            return d
        d -= 8
    return batch  # full dim is always a legal block


def _pick_seq_tile(seq, tb, atten, budget_bytes=2 << 20):
    # Bound the per-step x block (and its few same-sized f32 temporaries) so tiles
    # stay well inside VMEM even on v7x (64 MiB total) with double buffering,
    # while keeping tiles big enough to amortize the ~0.35us per-grid-step cost.
    cap = max(1, budget_bytes // max(1, tb * atten * 4))
    if seq <= cap:
        return seq
    for d in range(min(seq, cap), 0, -1):
        if seq % d == 0:
            return d
    return seq


def attention_forward(x, w, b, *, seq_tile=None, batch_tile=None):
    """x: (S, B, A), w: (A, 1), b: (A,) -> (B, A)"""
    S, B, A = x.shape
    w2 = w.reshape(1, A)
    b2 = b.reshape(1, A)

    tb = batch_tile if batch_tile is not None else _pick_batch_tile(B)
    ts = seq_tile if seq_tile is not None else _pick_seq_tile(S, tb, A)
    assert B % tb == 0 and S % ts == 0, "tiles must evenly divide (B, S)"
    assert tb == B or tb % 8 == 0, "batch tile must be a multiple of 8 or the full batch"

    grid = (B // tb, S // ts)

    return pl.pallas_call(
        attention_kernel,
        out_shape=jax.ShapeDtypeStruct((B, A), x.dtype),
        grid_spec=pltpu.PrefetchScalarGridSpec(
            num_scalar_prefetch=0,
            grid=grid,
            in_specs=[
                pl.BlockSpec((ts, tb, A), lambda bi, si: (si, bi, 0)),
                pl.BlockSpec((1, A), lambda bi, si: (0, 0)),   # w: resident across grid
                pl.BlockSpec((1, A), lambda bi, si: (0, 0)),   # b: resident across grid
            ],
            out_specs=pl.BlockSpec((tb, A), lambda bi, si: (bi, 0)),
            scratch_shapes=[
                pltpu.VMEM((tb, A), jnp.float32),   # num accumulator
                pltpu.VMEM((tb, A), jnp.float32),   # den accumulator
            ],
        ),
        compiler_params=pltpu.CompilerParams(
            dimension_semantics=("parallel", "arbitrary"),
        ),
    )(x, w2, b2)


def attention_reference(x, w, b):
    """Pure-JAX reference matching the torch semantics exactly."""
    dot = jnp.matmul(x, w) + b
    dot = jnp.tanh(dot)
    alpha = jax.nn.softmax(dot, axis=0)
    return jnp.sum(x * alpha, axis=0)


if __name__ == "__main__":
    key = jax.random.PRNGKey(0)
    kx, kw, kx2 = jax.random.split(key, 3)

    # Small shapes implied by the module: seq=8, batch=2, atten_size=32.
    SEQ, BATCH, ATTEN = 8, 2, 32
    x = jax.random.normal(kx, (SEQ, BATCH, ATTEN), dtype=jnp.float32)
    w = jax.random.uniform(kw, (ATTEN, 1), dtype=jnp.float32)   # torch.rand
    b = jnp.zeros((ATTEN,), dtype=jnp.float32)                  # torch.zeros

    out = jax.block_until_ready(attention_forward(x, w, b))
    ref = attention_reference(x, w, b)
    np.testing.assert_allclose(np.asarray(out), np.asarray(ref), rtol=1e-5, atol=1e-5)
    assert out.shape == (BATCH, ATTEN)

    # Second check exercising the real (B, S) grid / streaming-accumulator path.
    S2, B2, A2 = 64, 16, 128
    x2 = jax.random.normal(kx2, (S2, B2, A2), dtype=jnp.float32)
    w2 = jax.random.uniform(kw, (A2, 1), dtype=jnp.float32)
    b2 = jnp.zeros((A2,), dtype=jnp.float32)
    out2 = jax.block_until_ready(
        attention_forward(x2, w2, b2, seq_tile=8, batch_tile=8))
    ref2 = attention_reference(x2, w2, b2)
    np.testing.assert_allclose(np.asarray(out2), np.asarray(ref2), rtol=1e-5, atol=1e-5)

    print("KERNEL_OK")
</pallas_src>

<mosaic_0001>
module attributes {stable_mosaic.version = 11 : i64} {
  func.func @attention_kernel(%arg0: i32, %arg1: i32, %arg2: memref<8x2x32xf32, #tpu.memory_space<vmem>>, %arg3: memref<1x32xf32, #tpu.memory_space<vmem>>, %arg4: memref<1x32xf32, #tpu.memory_space<vmem>>, %arg5: memref<2x32xf32, #tpu.memory_space<vmem>>, %arg6: memref<2x32xf32, #tpu.memory_space<vmem>>, %arg7: memref<2x32xf32, #tpu.memory_space<vmem>>) attributes {dimension_semantics = [#tpu.dimension_semantics<parallel>, #tpu.dimension_semantics<arbitrary>], iteration_bounds = array<i64: 1, 1>, scalar_prefetch = 0 : i64, scratch_operands = 2 : i64, tpu.core_type = #tpu.core_type<tc>, window_params = [{transform_indices = @transform_0, window_bounds = array<i64: 8, 2, 32>}, {pipeline_mode = #tpu.pipeline_mode<synchronous>, transform_indices = @transform_1, window_bounds = array<i64: 1, 32>}, {pipeline_mode = #tpu.pipeline_mode<synchronous>, transform_indices = @transform_2, window_bounds = array<i64: 1, 32>}, {transform_indices = @transform_3, window_bounds = array<i64: 2, 32>}]} {
    %c0_i32 = arith.constant 0 : i32
    %0 = arith.cmpi eq, %arg1, %c0_i32 : i32
    %1 = arith.extui %0 : i1 to i32
    %c0_i32_0 = arith.constant 0 : i32
    %2 = arith.cmpi ne, %1, %c0_i32_0 : i32
    scf.if %2 {
      %cst_19 = arith.constant 0.000000e+00 : f32
      %29 = vector.broadcast %cst_19 : f32 to vector<2x32xf32>
      %c0_20 = arith.constant 0 : index
      %c0_21 = arith.constant 0 : index
      %30 = vector.load %arg6[%c0_20, %c0_21] : memref<2x32xf32, #tpu.memory_space<vmem>>, vector<2x32xf32>
      tpu.vector_store %arg6[%c0_20, %c0_21], %29 {strides = array<i32>} : memref<2x32xf32, #tpu.memory_space<vmem>>, vector<2x32xf32>,
      %cst_22 = arith.constant 0.000000e+00 : f32
      %31 = vector.broadcast %cst_22 : f32 to vector<2x32xf32>
      %c0_23 = arith.constant 0 : index
      %c0_24 = arith.constant 0 : index
      %32 = vector.load %arg7[%c0_23, %c0_24] : memref<2x32xf32, #tpu.memory_space<vmem>>, vector<2x32xf32>
      tpu.vector_store %arg7[%c0_23, %c0_24], %31 {strides = array<i32>} : memref<2x32xf32, #tpu.memory_space<vmem>>, vector<2x32xf32>,
    } else {
    }
    %c0 = arith.constant 0 : index
    %c0_1 = arith.constant 0 : index
    %c0_2 = arith.constant 0 : index
    %3 = vector.load %arg2[%c0, %c0_1, %c0_2] : memref<8x2x32xf32, #tpu.memory_space<vmem>>, vector<8x2x32xf32>
    %c0_3 = arith.constant 0 : index
    %c0_4 = arith.constant 0 : index
    %4 = vector.load %arg3[%c0_3, %c0_4] : memref<1x32xf32, #tpu.memory_space<vmem>>, vector<1x32xf32>
    %c0_5 = arith.constant 0 : index
    %c0_6 = arith.constant 0 : index
    %5 = vector.load %arg4[%c0_5, %c0_6] : memref<1x32xf32, #tpu.memory_space<vmem>>, vector<1x32xf32>
    %6 = vector.shape_cast %4 : vector<1x32xf32> to vector<1x1x32xf32>
    %7 = vector.broadcast %6 : vector<1x1x32xf32> to vector<8x2x32xf32>
    %8 = arith.mulf %3, %7 : vector<8x2x32xf32>
    %cst = arith.constant dense<0.000000e+00> : vector<8x2xf32>
    %9 = vector.multi_reduction <add>, %8, %cst [2] : vector<8x2x32xf32> to vector<8x2xf32>
    %10 = vector.shape_cast %9 : vector<8x2xf32> to vector<8x2x1xf32>
    %11 = vector.shape_cast %5 : vector<1x32xf32> to vector<1x1x32xf32>
    %12 = vector.broadcast %10 : vector<8x2x1xf32> to vector<8x2x32xf32>
    %13 = vector.broadcast %11 : vector<1x1x32xf32> to vector<8x2x32xf32>
    %14 = arith.addf %12, %13 : vector<8x2x32xf32>
    %15 = math.tanh %14 : vector<8x2x32xf32>
    %16 = math.exp %15 : vector<8x2x32xf32>
    %c0_7 = arith.constant 0 : index
    %c0_8 = arith.constant 0 : index
    %17 = vector.load %arg6[%c0_7, %c0_8] : memref<2x32xf32, #tpu.memory_space<vmem>>, vector<2x32xf32>
    %18 = arith.mulf %3, %16 : vector<8x2x32xf32>
    %cst_9 = arith.constant dense<0.000000e+00> : vector<2x32xf32>
    %19 = vector.multi_reduction <add>, %18, %cst_9 [0] : vector<8x2x32xf32> to vector<2x32xf32>
    %20 = arith.addf %17, %19 : vector<2x32xf32>
    %c0_10 = arith.constant 0 : index
    %c0_11 = arith.constant 0 : index
    %21 = vector.load %arg6[%c0_10, %c0_11] : memref<2x32xf32, #tpu.memory_space<vmem>>, vector<2x32xf32>
    tpu.vector_store %arg6[%c0_10, %c0_11], %20 {strides = array<i32>} : memref<2x32xf32, #tpu.memory_space<vmem>>, vector<2x32xf32>,
    %c0_12 = arith.constant 0 : index
    %c0_13 = arith.constant 0 : index
    %22 = vector.load %arg7[%c0_12, %c0_13] : memref<2x32xf32, #tpu.memory_space<vmem>>, vector<2x32xf32>
    %cst_14 = arith.constant dense<0.000000e+00> : vector<2x32xf32>
    %23 = vector.multi_reduction <add>, %16, %cst_14 [0] : vector<8x2x32xf32> to vector<2x32xf32>
    %24 = arith.addf %22, %23 : vector<2x32xf32>
    %c0_15 = arith.constant 0 : index
    %c0_16 = arith.constant 0 : index
    %25 = vector.load %arg7[%c0_15, %c0_16] : memref<2x32xf32, #tpu.memory_space<vmem>>, vector<2x32xf32>
    tpu.vector_store %arg7[%c0_15, %c0_16], %24 {strides = array<i32>} : memref<2x32xf32, #tpu.memory_space<vmem>>, vector<2x32xf32>,
    %c0_i32_17 = arith.constant 0 : i32
    %26 = arith.cmpi eq, %arg1, %c0_i32_17 : i32
    %27 = arith.extui %26 : i1 to i32
    %c0_i32_18 = arith.constant 0 : i32
    %28 = arith.cmpi ne, %27, %c0_i32_18 : i32
    scf.if %28 {
      %c0_19 = arith.constant 0 : index
      %c0_20 = arith.constant 0 : index
      %29 = vector.load %arg7[%c0_19, %c0_20] : memref<2x32xf32, #tpu.memory_space<vmem>>, vector<2x32xf32>
      %30 = tpu.reciprocal %29 {approx = true} : vector<2x32xf32> -> vector<2x32xf32>
      %31 = arith.mulf %29, %30 : vector<2x32xf32>
      %cst_21 = arith.constant 2.000000e+00 : f32
      %32 = vector.broadcast %cst_21 : f32 to vector<2x32xf32>
      %33 = arith.subf %32, %31 : vector<2x32xf32>
      %34 = arith.mulf %30, %33 : vector<2x32xf32>
      %c0_22 = arith.constant 0 : index
      %c0_23 = arith.constant 0 : index
      %35 = vector.load %arg6[%c0_22, %c0_23] : memref<2x32xf32, #tpu.memory_space<vmem>>, vector<2x32xf32>
      %36 = arith.mulf %35, %34 : vector<2x32xf32>
      %c0_24 = arith.constant 0 : index
      %c0_25 = arith.constant 0 : index
      %37 = vector.load %arg5[%c0_24, %c0_25] : memref<2x32xf32, #tpu.memory_space<vmem>>, vector<2x32xf32>
      tpu.vector_store %arg5[%c0_24, %c0_25], %36 {strides = array<i32>} : memref<2x32xf32, #tpu.memory_space<vmem>>, vector<2x32xf32>,
    } else {
    }
    return
  }
  func.func @transform_0(%arg0: i32, %arg1: i32) -> (i32, i32, i32) {
    %c0_i32 = arith.constant 0 : i32
    %c0_i32_0 = arith.constant 0 : i32
    return %arg1, %arg0, %c0_i32 : i32, i32, i32
  }
  func.func @transform_1(%arg0: i32, %arg1: i32) -> (i32, i32) {
    %c0_i32 = arith.constant 0 : i32
    %c0_i32_0 = arith.constant 0 : i32
    %c0_i32_1 = arith.constant 0 : i32
    return %c0_i32, %c0_i32_0 : i32, i32
  }
  func.func @transform_2(%arg0: i32, %arg1: i32) -> (i32, i32) {
    %c0_i32 = arith.constant 0 : i32
    %c0_i32_0 = arith.constant 0 : i32
    %c0_i32_1 = arith.constant 0 : i32
    return %c0_i32, %c0_i32_0 : i32, i32
  }
  func.func @transform_3(%arg0: i32, %arg1: i32) -> (i32, i32) {
    %c0_i32 = arith.constant 0 : i32
    %c0_i32_0 = arith.constant 0 : i32
    return %arg0, %c0_i32 : i32, i32
  }
}

</mosaic_0001>

<bundles_post_ra>
// kernel: tpu_custom_call.1
= control target key start
LH: loop header
LB: loop body
LE: loop exit
PB: predicated region body
PF: predicated region fallthrough
CT: control target
= control target key end

     0   :  { %8 = vsyncpa [#allocation5], 0  ;;  %s398_s0 = inlined_call_operand.hbm [shape: f32[8,2,32], index: 0, kind: input, shape index: {}]   ;;  %s399_s1 = inlined_call_operand.vmem [shape: f32[1,32], index: 1, kind: input, shape index: {}]   ;;  %s400_s2 = inlined_call_operand.vmem [shape: f32[1,32], index: 2, kind: input, shape index: {}]   ;;  %s401_s3 = inlined_call_operand.hbm [shape: f32[2,32], index: 3, kind: output, shape index: {}]  }
   0x1   :  { %9 = vsyncpa [#allocation6], 0  ;;  %s282_s12 = smov [#allocation4]   ;;  %s234_s16 = scalar_lea.hbm %s398_s0, 256 }
   0x2   :  { %s15_s13 = sshll.u32 %s282_s12, 4  ;;  %p235_p0 = scmp.ne.s32.totalorder %s398_s0, %s234_s16  ;;  %s16_s13 = int_to_ptr.vmem [resolvable:$true] %s15_s13 }
   0x3   :  { %p238_p1 = scmp.lt.u32.totalorder %s234_s16, %s398_s0 }
   0x5   :  { %p240_p2 = pnand %p238_p1, %p235_p0 }
   0x7   :  { %243 = shalt.err (!%p240_p2)
}
   0x8   :  { %s244_s21 = scalar_lea.vmem %s16_s13, 256  ;;  %p249_p4 = scmp.lt.s32.totalorder %s16_s13, %s16_s13 }
   0x9   :  { %p245_p3 = scmp.ne.s32.totalorder %s16_s13, %s244_s21  ;;  %p250_p5 = scmp.lt.s32.totalorder %s244_s21, %s244_s21 }
   0xb   :  { %p251_p6 = por %p250_p5, %p249_p4 }
   0xd   :  { %p252_p7 = pnand %p251_p6, %p245_p3 }
   0xf   :  { %255 = shalt.err (!%p252_p7)
}
  0x10   :  { %s283_s22 = smov 32   ;;  %s284_s23 = smov 2  }
  0x11   :  { %21 = dma.hbm_to_vmem [thread:$0]  %s398_s0, 256, %s16_s13, [#allocation5], %s283_s22, %s283_s22, %s284_s23  }
  0x12   :  { %278 = dma.done.wait [#allocation5], 256  }
  0x13   :  { %279 = vsyncadd [#allocation5], 4294967040  ;;  %vm33_vm0 = vcmask 254976   ;;  %v319_v0 = vld [vmem:[#allocation4] sm:$0x3]  ;;  %v285_v25 = vmov 0.0  }
  0x14   :  { %v193_v1 = vld [vmem:[%s399_s1] ss:$0 sm:$0xff]  ;;  %v324_v2 = vld [vmem:[#allocation4 + $0x4] sm:$0x3]  ;;  %v328_v5 = vld [vmem:[#allocation4 + $0x2] sm:$0x3] }
  0x15   :  { %v52_v3 = vmul.f32 %v193_v1, %v319_v0  ;;  %v54_v4 = vmul.f32 %v193_v1, %v324_v2  ;;  %v330_v6 = vld [vmem:[#allocation4 + $0x6] sm:$0x3]  ;;  %v53_v7 = vmul.f32 %v193_v1, %v328_v5  ;;  %v334_v9 = vld [vmem:[#allocation4 + $0x8] sm:$0x3]  ;;  %v336_v10 = vld [vmem:[#allocation4 + $0xa] sm:$0x3] }
  0x16   :  { %v55_v8 = vmul.f32 %v193_v1, %v330_v6  ;;  %v56_v15 = vmul.f32 %v193_v1, %v334_v9  ;;  %v57_v16 = vmul.f32 %v193_v1, %v336_v10  ;;  %v344_v17 = vld [vmem:[#allocation4 + $0xc] sm:$0x3]  ;;  %v346_v18 = vld [vmem:[#allocation4 + $0xe] sm:$0x3]  ;;  %34 = vst.msk [vmem:[#allocation2] sm:$0x3] %vm33_vm0, %v285_v25 }
  0x17   :  { %v61_v11 = vsel %vm33_vm0, %v52_v3, 0.0  ;;  %v67_v12 = vsel %vm33_vm0, %v54_v4, 0.0  ;;  %v64_v13 = vsel %vm33_vm0, %v53_v7, 0.0  ;;  %v58_v21 = vmul.f32 %v193_v1, %v344_v17  ;;  %35 = vst.msk [vmem:[#allocation3] sm:$0x3] %vm33_vm0, %v285_v25 }
  0x18   :  { %62 = vadd.xlane.f32.xlu0 %v61_v11  ;;  %68 = vadd.xlane.f32.xlu1 %v67_v12  ;;  %v70_v14 = vsel %vm33_vm0, %v55_v8, 0.0  ;;  %v73_v19 = vsel %vm33_vm0, %v56_v15, 0.0  ;;  %v76_v20 = vsel %vm33_vm0, %v57_v16, 0.0  ;;  %v59_v22 = vmul.f32 %v193_v1, %v346_v18  ;;  %v194_v26 = vld [vmem:[%s400_s2] ss:$0 sm:$0xff]  ;;  %s286_s2 = smov [#allocation7]  }
  0x19   :  { %v79_v23 = vsel %vm33_vm0, %v58_v21, 0.0  ;;  %s184_s28 = sshll.u32 %s286_s2, 4  ;;  %s185_s28 = int_to_ptr.vmem [resolvable:$true] %s184_s28 }
  0x1a   :  { %v82_v24 = vsel %vm33_vm0, %v59_v22, 0.0  ;;  %s256_s29 = scalar_lea.vmem %s185_s28, 32  ;;  %p261_p9 = scmp.lt.s32.totalorder %s185_s28, %s185_s28 }
  0x1b   :  { %p257_p8 = scmp.ne.s32.totalorder %s185_s28, %s256_s29  ;;  %p262_p10 = scmp.lt.s32.totalorder %s256_s29, %s256_s29 }
  0x1c   :  { %65 = vadd.xlane.f32.xlu0 %v64_v13  ;;  %71 = vadd.xlane.f32.xlu1 %v70_v14 }
  0x1d   :  { %p263_p11 = por %p262_p10, %p261_p9 }
  0x1f   :  { %p264_p12 = pnand %p263_p11, %p257_p8 }
  0x20   :  { %74 = vadd.xlane.f32.xlu0 %v73_v19  ;;  %77 = vadd.xlane.f32.xlu1 %v76_v20 }
  0x24   :  { %80 = vadd.xlane.f32.xlu0 %v79_v23  ;;  %83 = vadd.xlane.f32.xlu1 %v82_v24 }
  0xa5   :  { %v63_v27 = vpop.xlane.xlu0 %62  ;;  %v69_v28 = vpop.xlane.xlu1 %68 }
  0xa6   :  { %v91_v29 = vadd.f32 %v194_v26, %v63_v27  ;;  %v93_v30 = vadd.f32 %v194_v26, %v69_v28 }
  0xa8   :  { %200 = vtanh.f32 %v91_v29 }
  0xa9   :  { %202 = vtanh.f32 %v93_v30  ;;  %v66_v31 = vpop.xlane.xlu0 %65  ;;  %v72_v32 = vpop.xlane.xlu1 %71 }
  0xaa   :  { %v92_v33 = vadd.f32 %v194_v26, %v66_v31  ;;  %v94_v34 = vadd.f32 %v194_v26, %v72_v32 }
  0xac   :  { %204 = vtanh.f32 %v92_v33 }
  0xad   :  { %206 = vtanh.f32 %v94_v34  ;;  %v75_v35 = vpop.xlane.xlu0 %74  ;;  %v78_v36 = vpop.xlane.xlu1 %77 }
  0xae   :  { %v95_v37 = vadd.f32 %v194_v26, %v75_v35  ;;  %v96_v38 = vadd.f32 %v194_v26, %v78_v36 }
  0xb0   :  { %208 = vtanh.f32 %v95_v37 }
  0xb1   :  { %210 = vtanh.f32 %v96_v38  ;;  %v81_v39 = vpop.xlane.xlu0 %80  ;;  %v84_v40 = vpop.xlane.xlu1 %83 }
  0xb2   :  { %v201_v41 = vpop.eup %200  ;;  %v97_v42 = vadd.f32 %v194_v26, %v81_v39  ;;  %v98_v45 = vadd.f32 %v194_v26, %v84_v40  ;;  %v149_v39 = vld [vmem:[#allocation3] sm:$0x3] }
  0xb3   :  { %v203_v43 = vpop.eup %202  ;;  %v107_v44 = vmul.f32 1.442695, %v201_v41 }
  0xb4   :  { %v111_v46 = vmul.f32 1.442695, %v203_v43  ;;  %212 = vtanh.f32 %v97_v42  ;;  %v123_v43 = vld [vmem:[#allocation2] sm:$0x3] }
  0xb5   :  { %214 = vpow2.f32 %v107_v44 }
  0xb6   :  { %v205_v47 = vpop.eup %204  ;;  %216 = vpow2.f32 %v111_v46 }
  0xb7   :  { %v207_v48 = vpop.eup %206  ;;  %v109_v49 = vmul.f32 1.442695, %v205_v47  ;;  %218 = vtanh.f32 %v98_v45 }
  0xb8   :  { %v113_v50 = vmul.f32 1.442695, %v207_v48 }
  0xb9   :  { %220 = vpow2.f32 %v109_v49 }
  0xba   :  { %v209_v51 = vpop.eup %208  ;;  %222 = vpow2.f32 %v113_v50 }
  0xbb   :  { %v211_v52 = vpop.eup %210  ;;  %v115_v53 = vmul.f32 1.442695, %v209_v51 }
  0xbc   :  { %v117_v54 = vmul.f32 1.442695, %v211_v52 }
  0xbd   :  { %224 = vpow2.f32 %v115_v53 }
  0xbe   :  { %v213_v55 = vpop.eup %212  ;;  %226 = vpow2.f32 %v117_v54 }
  0xbf   :  { %v215_v56 = vpop.eup %214  ;;  %v119_v57 = vmul.f32 1.442695, %v213_v55 }
  0xc0   :  { %v217_v58 = vpop.eup %216  ;;  %v124_v60 = vmul.f32 %v215_v56, %v319_v0  ;;  %v150_v63 = vsel %vm33_vm0, %v215_v56, 0.0 }
  0xc1   :  { %v219_v59 = vpop.eup %218  ;;  %228 = vpow2.f32 %v119_v57  ;;  %v126_v3 = vmul.f32 %v217_v58, %v324_v2  ;;  %v153_v13 = vsel %vm33_vm0, %v217_v58, 0.0 }
  0xc2   :  { %v121_v61 = vmul.f32 1.442695, %v219_v59  ;;  %v132_v12 = vsel %vm33_vm0, %v124_v60, 0.0 }
  0xc3   :  { %v221_v62 = vpop.eup %220 }
  0xc4   :  { %v223_v1 = vpop.eup %222  ;;  %v125_v4 = vmul.f32 %v221_v62, %v328_v5  ;;  %v151_v7 = vsel %vm33_vm0, %v221_v62, 0.0  ;;  %230 = vpow2.f32 %v121_v61  ;;  %v135_v5 = vsel %vm33_vm0, %v126_v3, 0.0 }
  0xc5   :  { %v152_v8 = vadd.f32 %v151_v7, %v150_v63  ;;  %v127_v11 = vmul.f32 %v223_v1, %v330_v6  ;;  %v155_v14 = vsel %vm33_vm0, %v223_v1, 0.0 }
  0xc6   :  { %v133_v0 = vsel %vm33_vm0, %v125_v4, 0.0 }
  0xc7   :  { %v225_v15 = vpop.eup %224  ;;  %v134_v16 = vadd.f32 %v133_v0, %v132_v12  ;;  %v154_v19 = vadd.f32 %v153_v13, %v152_v8  ;;  %v137_v20 = vsel %vm33_vm0, %v127_v11, 0.0 }
  0xc8   :  { %v227_v2 = vpop.eup %226  ;;  %v128_v21 = vmul.f32 %v225_v15, %v334_v9  ;;  %v157_v6 = vsel %vm33_vm0, %v225_v15, 0.0 }
  0xc9   :  { %v136_v22 = vadd.f32 %v135_v5, %v134_v16  ;;  %v156_v23 = vadd.f32 %v155_v14, %v154_v19  ;;  %v129_v24 = vmul.f32 %v227_v2, %v336_v10  ;;  %v159_v26 = vsel %vm33_vm0, %v227_v2, 0.0 }
  0xca   :  { %v139_v25 = vsel %vm33_vm0, %v128_v21, 0.0 }
  0xcb   :  { %v229_v27 = vpop.eup %228  ;;  %v138_v28 = vadd.f32 %v137_v20, %v136_v22  ;;  %v158_v29 = vadd.f32 %v157_v6, %v156_v23  ;;  %v141_v30 = vsel %vm33_vm0, %v129_v24, 0.0 }
  0xcc   :  { %v130_v31 = vmul.f32 %v229_v27, %v344_v17  ;;  %v161_v32 = vsel %vm33_vm0, %v229_v27, 0.0 }
  0xcd   :  { %v140_v9 = vadd.f32 %v139_v25, %v138_v28  ;;  %v160_v33 = vadd.f32 %v159_v26, %v158_v29 }
  0xce   :  { %v231_v34 = vpop.eup %230  ;;  %v143_v35 = vsel %vm33_vm0, %v130_v31, 0.0 }
  0xcf   :  { %v142_v36 = vadd.f32 %v141_v30, %v140_v9  ;;  %v162_v10 = vadd.f32 %v161_v32, %v160_v33  ;;  %v131_v37 = vmul.f32 %v231_v34, %v346_v18  ;;  %v163_v38 = vsel %vm33_vm0, %v231_v34, 0.0 }
  0xd1   :  { %v144_v40 = vadd.f32 %v143_v35, %v142_v36  ;;  %v145_v41 = vsel %vm33_vm0, %v131_v37, 0.0  ;;  %v164_v42 = vadd.f32 %v163_v38, %v162_v10 }
  0xd3   :  { %v146_v17 = vadd.f32 %v145_v41, %v144_v40  ;;  %v165_v44 = vadd.f32 %v164_v42, %v149_v39 }
  0xd5   :  { %v147_v45 = vadd.f32 %v146_v17, %v123_v43  ;;  %166 = vst.msk [vmem:[#allocation3] sm:$0x3] %vm33_vm0, %v165_v44 }
  0xd7   :  { %148 = vst.msk [vmem:[#allocation2] sm:$0x3] %vm33_vm0, %v147_v45 }
  0xdc   :  { %v170_v46 = vld [vmem:[#allocation3] sm:$0x3] }
  0xdd   :  { %232 = vrcp.f32 %v170_v46 }
  0xde   :  { %v175_v50 = vld [vmem:[#allocation2] sm:$0x3] }
  0xe7   :  { %v233_v47 = vpop.eup %232 }
  0xe8   :  { %v172_v48 = vmul.f32 %v233_v47, %v170_v46 }
  0xea   :  { %v173_v18 = vsub.f32 2.0, %v172_v48 }
  0xec   :  { %v174_v49 = vmul.f32 %v233_v47, %v173_v18 }
  0xee   :  { %v176_v51 = vmul.f32 %v175_v50, %v174_v49 }
  0xf0   :  { %177 = vst.msk [vmem:[#allocation7] sm:$0x3] %vm33_vm0, %v176_v51 }
  0xf1   :  { %267 = shalt.err (!%p264_p12)
}
  0xf2   :  { %s268_s5 = scalar_lea.hbm %s401_s3, 32 }
  0xf3   :  { %p269_p13 = scmp.ne.s32.totalorder %s401_s3, %s268_s5  ;;  %p272_p0 = scmp.lt.u32.totalorder %s268_s5, %s401_s3 }
  0xf5   :  { %p274_p1 = pnand %p272_p0, %p269_p13 }
  0xf7   :  { %277 = shalt.err (!%p274_p1)
}
  0xf8   :  { %187 = dma.vmem_to_hbm [thread:$0]  %s185_s28, 32, %s401_s3, [#allocation6]  }
  0xf9   :  { %280 = dma.done.wait [#allocation6], 32  }
  0xfa   :  { %281 = vsyncadd [#allocation6], 4294967264 }
  0xfb   :  { %191 = vsyncpa [#allocation5], 1 }
  0xfc   :  { %192 = vsyncpa [#allocation6], 1 }

</bundles_post_ra>
